<compile_context>
chip_gen: v7x
topology: tpu7x:2x2x1
jax: 0.10.0
libtpu: 0.0.40
codegen_flags: <defaults>
</compile_context>

<pallas_src>
import functools

import numpy as np
import jax
import jax.numpy as jnp
from jax.experimental import pallas as pl
from jax.experimental.pallas import tpu as pltpu

# ---------------- DenseNet-201 architecture constants ----------------
GROWTH = 32
BLOCK_CONFIG = (6, 12, 48, 32)          # densenet201
NUM_INIT_FEATURES = 64
BN_SIZE = 4
BN_EPS = 1e-5
FEATURE_DIM = 1920                      # channels entering the classifier
BOTTLENECK = BN_SIZE * GROWTH           # 128
STEM_KPAD = 256                         # 7*7*3 = 147 rounded up to a multiple of 128

_PARALLEL = pltpu.CompilerParams(dimension_semantics=("parallel",))
_ARBITRARY = pltpu.CompilerParams(dimension_semantics=("arbitrary",))


def _round_up(v, m):
    return ((v + m - 1) // m) * m


def _choose_tm(m):
    # Tile M by 128 where it divides evenly so multi-step grids can be sharded
    # across the two TensorCores of a v7x chip ("parallel" axis); otherwise one block.
    return 128 if (m > 128 and m % 128 == 0) else m


# ------------------------------ Pallas kernels ------------------------------
def _dense_layer_kernel(x_ref, s1_ref, b1_ref, w1_ref, s2_ref, b2_ref, o_ref):
    # o = relu((relu(x*s1+b1) @ W1) * s2 + b2)   -- BN1+ReLU+1x1conv+BN2+ReLU fused.
    x = jnp.maximum(x_ref[...].astype(jnp.float32) * s1_ref[...] + b1_ref[...], 0.0)
    y = jnp.dot(x.astype(jnp.bfloat16), w1_ref[...],
                preferred_element_type=jnp.float32)
    o_ref[...] = jnp.maximum(y * s2_ref[...] + b2_ref[...], 0.0).astype(o_ref.dtype)


def _matmul_affine_relu_kernel(x_ref, w_ref, s_ref, b_ref, o_ref):
    # o = relu((x @ W) * s + b)     -- stem conv0 + norm0 + relu0 fused.
    y = jnp.dot(x_ref[...], w_ref[...], preferred_element_type=jnp.float32)
    o_ref[...] = jnp.maximum(y * s_ref[...] + b_ref[...], 0.0).astype(o_ref.dtype)


def _plain_matmul_kernel(x_ref, w_ref, o_ref):
    # 3x3 conv (im2col, K=1152 exact) and transition 1x1 conv (no bias).
    o_ref[...] = jnp.dot(x_ref[...], w_ref[...],
                         preferred_element_type=jnp.float32).astype(o_ref.dtype)


def _head_kernel(x_ref, s_ref, b_ref, w_ref, bias_ref, o_ref):
    # o = (x * s5 + b5) @ Wfc + bfc    -- norm5 (no relu) fused with the classifier.
    x = x_ref[...].astype(jnp.float32) * s_ref[...] + b_ref[...]
    o_ref[...] = (jnp.dot(x.astype(jnp.bfloat16), w_ref[...],
                          preferred_element_type=jnp.float32) + bias_ref[...])


def _maxpool_kernel(x_ref, o_ref):
    # x: (9, M, C) stacked 3x3 taps -> max over taps.
    o_ref[...] = jnp.max(x_ref[...], axis=0).astype(o_ref.dtype)


def _avgpool_affine_relu_kernel(x_ref, s_ref, b_ref, o_ref):
    # x: (4, M, C) stacked 2x2 taps -> mean over taps of relu(x*s+b) (transition BN+ReLU+pool).
    y = jnp.maximum(x_ref[...].astype(jnp.float32) * s_ref[...] + b_ref[...], 0.0)
    o_ref[...] = jnp.mean(y, axis=0).astype(o_ref.dtype)


# --------------------------- jitted pallas_call wrappers ---------------------------
@jax.jit
def dense_layer_matmul(x, s1, b1, w1, s2, b2):
    m, k = x.shape
    n = w1.shape[1]
    tm = _choose_tm(m)
    return pl.pallas_call(
        _dense_layer_kernel,
        out_shape=jax.ShapeDtypeStruct((m, n), jnp.bfloat16),
        grid=(m // tm,),
        in_specs=[pl.BlockSpec((tm, k), lambda i: (i, 0)),
                  pl.BlockSpec((1, k), lambda i: (0, 0)),
                  pl.BlockSpec((1, k), lambda i: (0, 0)),
                  pl.BlockSpec((k, n), lambda i: (0, 0)),
                  pl.BlockSpec((1, n), lambda i: (0, 0)),
                  pl.BlockSpec((1, n), lambda i: (0, 0))],
        out_specs=pl.BlockSpec((tm, n), lambda i: (i, 0)),
        compiler_params=_PARALLEL,
    )(x, s1, b1, w1, s2, b2)


@jax.jit
def matmul_affine_relu(x, w, s, b):
    m, k = x.shape
    n = w.shape[1]
    tm = _choose_tm(m)
    return pl.pallas_call(
        _matmul_affine_relu_kernel,
        out_shape=jax.ShapeDtypeStruct((m, n), jnp.bfloat16),
        grid=(m // tm,),
        in_specs=[pl.BlockSpec((tm, k), lambda i: (i, 0)),
                  pl.BlockSpec((k, n), lambda i: (0, 0)),
                  pl.BlockSpec((1, n), lambda i: (0, 0)),
                  pl.BlockSpec((1, n), lambda i: (0, 0))],
        out_specs=pl.BlockSpec((tm, n), lambda i: (i, 0)),
        compiler_params=_PARALLEL,
    )(x, w, s, b)


@jax.jit
def plain_matmul(x, w):
    m, k = x.shape
    n = w.shape[1]
    tm = _choose_tm(m)
    return pl.pallas_call(
        _plain_matmul_kernel,
        out_shape=jax.ShapeDtypeStruct((m, n), jnp.bfloat16),
        grid=(m // tm,),
        in_specs=[pl.BlockSpec((tm, k), lambda i: (i, 0)),
                  pl.BlockSpec((k, n), lambda i: (0, 0))],
        out_specs=pl.BlockSpec((tm, n), lambda i: (i, 0)),
        compiler_params=_PARALLEL,
    )(x, w)


@jax.jit
def head_matmul(x, s, b, w, bias):
    m, k = x.shape
    n = w.shape[1]
    return pl.pallas_call(
        _head_kernel,
        out_shape=jax.ShapeDtypeStruct((m, n), jnp.float32),
        grid=(1,),
        in_specs=[pl.BlockSpec((m, k), lambda i: (0, 0)),
                  pl.BlockSpec((1, k), lambda i: (0, 0)),
                  pl.BlockSpec((1, k), lambda i: (0, 0)),
                  pl.BlockSpec((k, n), lambda i: (0, 0)),
                  pl.BlockSpec((1, n), lambda i: (0, 0))],
        out_specs=pl.BlockSpec((m, n), lambda i: (0, 0)),
        compiler_params=_ARBITRARY,
    )(x, s, b, w, bias)


@jax.jit
def maxpool_stack(x):
    t, m, c = x.shape
    return pl.pallas_call(
        _maxpool_kernel,
        out_shape=jax.ShapeDtypeStruct((m, c), x.dtype),
        grid=(1,),
        in_specs=[pl.BlockSpec((t, m, c), lambda i: (0, 0, 0))],
        out_specs=pl.BlockSpec((m, c), lambda i: (0, 0)),
        compiler_params=_ARBITRARY,
    )(x)


@jax.jit
def avgpool4_affine_relu(x, s, b):
    t, m, c = x.shape
    return pl.pallas_call(
        _avgpool_affine_relu_kernel,
        out_shape=jax.ShapeDtypeStruct((m, c), jnp.bfloat16),
        grid=(1,),
        in_specs=[pl.BlockSpec((t, m, c), lambda i: (0, 0, 0)),
                  pl.BlockSpec((1, 1, c), lambda i: (0, 0, 0)),
                  pl.BlockSpec((1, 1, c), lambda i: (0, 0, 0))],
        out_specs=pl.BlockSpec((m, c), lambda i: (0, 0)),
        compiler_params=_ARBITRARY,
    )(x, s, b)


# ------------------------------ jitted stage functions (glue + kernels) ------------------------------
@jax.jit
def stem_forward(x_nchw, w0, s0, b0):
    """conv0 7x7/2 + norm0 + relu0 (fused matmul kernel) + maxpool 3x3/2 (reduction kernel)."""
    x = jnp.transpose(x_nchw.astype(jnp.float32), (0, 2, 3, 1))       # NCHW -> NHWC
    n, hh, ww, cin = x.shape
    ho = (hh + 2 * 3 - 7) // 2 + 1
    wo = (ww + 2 * 3 - 7) // 2 + 1
    xp = jnp.pad(x, ((0, 0), (3, 3), (3, 3), (0, 0)))
    cols = [xp[:, i:i + 2 * ho:2, j:j + 2 * wo:2, :] for i in range(7) for j in range(7)]
    patches = jnp.concatenate(cols, axis=-1).reshape(n * ho * wo, 49 * cin)
    patches = patches.astype(jnp.bfloat16)
    m = n * ho * wo
    mp = _round_up(m, 128) if m > 128 else _round_up(m, 8)
    patches = jnp.pad(patches, ((0, mp - m), (0, w0.shape[0] - patches.shape[1])))
    y = matmul_affine_relu(patches, w0, s0, b0)                       # (mp, 128) bf16
    y = y[:m, :NUM_INIT_FEATURES].reshape(n, ho, wo, NUM_INIT_FEATURES)

    po = (ho + 2 - 3) // 2 + 1
    qo = (wo + 2 - 3) // 2 + 1
    yp = jnp.pad(y, ((0, 0), (1, 1), (1, 1), (0, 0)), constant_values=-jnp.inf)
    taps = [yp[:, i:i + 2 * po:2, j:j + 2 * qo:2, :] for i in range(3) for j in range(3)]
    stacked = jnp.stack(taps, axis=0).reshape(9, n * po * qo, NUM_INIT_FEATURES)
    return maxpool_stack(stacked)                                     # (n*po*qo, 64) bf16


@functools.partial(jax.jit, static_argnames=("n", "h", "w"))
def conv3x3_tail(y128, w2, n, h, w):
    """3x3/s1/p1 conv of the 128-channel bottleneck as one exact-K matmul (K=1152)."""
    mpad, cb = y128.shape
    m = n * h * w
    y = y128[:m].reshape(n, h, w, cb)
    yp = jnp.pad(y, ((0, 0), (1, 1), (1, 1), (0, 0)))
    cols = [yp[:, i:i + h, j:j + w, :] for i in range(3) for j in range(3)]
    patches = jnp.concatenate(cols, axis=-1).reshape(m, 9 * cb)
    patches = jnp.pad(patches, ((0, mpad - m), (0, 0)))
    out = plain_matmul(patches, w2)                                   # (mpad, 128) bf16
    return out[:, :GROWTH]                                            # (mpad, 32), pad rows are 0


@functools.partial(jax.jit, static_argnames=("n", "h", "w", "c", "cout", "kpad_next"))
def transition_forward(buf, scale, shift, wt, n, h, w, c, cout, kpad_next):
    """Transition: fused BN+ReLU+avgpool2x2 kernel, then 1x1 conv matmul on 4x fewer rows
    (avgpool and the bias-free 1x1 conv commute)."""
    m = n * h * w
    x = buf[:m, :c].reshape(n, h, w, c)
    ho, wo = h // 2, w // 2
    taps = [x[:, i::2, j::2, :][:, :ho, :wo, :] for i in range(2) for j in range(2)]
    mo = n * ho * wo
    stacked = jnp.stack(taps, axis=0).reshape(4, mo, c)
    mop = _round_up(mo, 8)
    stacked = jnp.pad(stacked, ((0, 0), (0, mop - mo), (0, 0)))
    pooled = avgpool4_affine_relu(stacked, scale, shift)              # (mop, c) bf16
    out = plain_matmul(pooled, wt)                                    # (mop, cout) bf16
    return jnp.pad(out, ((0, 0), (0, kpad_next - cout)))              # next block's buffer


@functools.partial(jax.jit, static_argnames=("n", "h", "w", "num_classes"))
def head_forward(buf, s5, b5, wf, fb, n, h, w, num_classes):
    """norm5 (no ReLU) + adaptive avg pool + flatten + fc, fused into one kernel."""
    m = n * h * w
    c = buf.shape[1]
    x = buf[:m].reshape(n, h * w, c)
    if h * w > 1:
        # TODO(synk): spatial mean for >1x1 final feature maps runs in XLA here (never hit
        #             for 32x32 inputs, where block4 spatial is 1x1).
        feat = jnp.mean(x.astype(jnp.float32), axis=1).astype(jnp.bfloat16)
    else:
        feat = x[:, 0, :]
    npad = _round_up(n, 8)
    feat = jnp.pad(feat, ((0, npad - n), (0, 0)))
    out = head_matmul(feat, s5, b5, wf, fb)                           # (npad, ncls_pad) f32
    return out[:n, :num_classes]


# ------------------------------ deterministic parameters ------------------------------
def _he_conv(rng, kh, kw, cin, cout):
    std = np.sqrt(2.0 / (kh * kw * cin))
    w = rng.standard_normal((kh, kw, cin, cout)).astype(np.float32) * np.float32(std)
    return w.reshape(kh * kw * cin, cout)            # (KH*KW*Cin, Cout) float32


def _bn_fold(rng, c):
    gamma = (1.0 + 0.05 * rng.standard_normal(c)).astype(np.float32)
    beta = (0.05 * rng.standard_normal(c)).astype(np.float32)
    mean = (0.05 * rng.standard_normal(c)).astype(np.float32)
    var = np.ones(c, np.float32)
    scale = gamma / np.sqrt(var + BN_EPS)
    shift = beta - mean * scale
    return scale.astype(np.float32), shift.astype(np.float32)


def _pad_np(a, shape):
    pads = [(0, s - d) for d, s in zip(a.shape, shape)]
    return np.pad(a, pads).astype(np.float32)


def build_params(num_classes, seed=0):
    rng = np.random.default_rng(seed)
    P = {}
    # stem: conv0 7x7/2 (3 -> 64, no bias) + norm0
    w0 = _he_conv(rng, 7, 7, 3, NUM_INIT_FEATURES)
    P["conv0_w"] = jnp.asarray(_pad_np(w0, (STEM_KPAD, 128)), jnp.bfloat16)
    s0, b0 = _bn_fold(rng, NUM_INIT_FEATURES)
    P["norm0_scale"] = jnp.asarray(_pad_np(s0.reshape(1, -1), (1, 128)))
    P["norm0_shift"] = jnp.asarray(_pad_np(b0.reshape(1, -1), (1, 128)))

    blocks = []
    c = NUM_INIT_FEATURES
    for bi, nlayers in enumerate(BLOCK_CONFIG):
        kpad = c + nlayers * GROWTH                 # per-block K pad = final channel count
        layers = []
        for _ in range(nlayers):
            s1, sh1 = _bn_fold(rng, c)
            w1 = _he_conv(rng, 1, 1, c, BOTTLENECK)
            s2, sh2 = _bn_fold(rng, BOTTLENECK)
            w2 = _he_conv(rng, 3, 3, BOTTLENECK, GROWTH)       # (1152, 32)
            layers.append(dict(
                scale1=jnp.asarray(_pad_np(s1.reshape(1, -1), (1, kpad))),
                shift1=jnp.asarray(_pad_np(sh1.reshape(1, -1), (1, kpad))),
                w1=jnp.asarray(_pad_np(w1, (kpad, BOTTLENECK)), jnp.bfloat16),
                scale2=jnp.asarray(s2.reshape(1, -1)),
                shift2=jnp.asarray(sh2.reshape(1, -1)),
                w2=jnp.asarray(_pad_np(w2, (9 * BOTTLENECK, 128)), jnp.bfloat16),
            ))
            c += GROWTH
        assert c == kpad
        block = dict(layers=layers, kpad=kpad, trans=None)
        if bi != len(BLOCK_CONFIG) - 1:             # transition (BN+ReLU, 1x1 conv, avgpool)
            st, bt = _bn_fold(rng, c)
            cout = c // 2
            wt = _he_conv(rng, 1, 1, c, cout)
            block["trans"] = dict(
                cout=cout,
                scale=jnp.asarray(st.reshape(1, 1, -1)),
                shift=jnp.asarray(bt.reshape(1, 1, -1)),
                w=jnp.asarray(wt, jnp.bfloat16),
            )
            c = cout
        blocks.append(block)
    P["blocks"] = blocks

    assert c == FEATURE_DIM, c
    s5, b5 = _bn_fold(rng, c)
    P["norm5_scale"] = jnp.asarray(s5.reshape(1, -1))
    P["norm5_shift"] = jnp.asarray(b5.reshape(1, -1))

    # classifier: nn.Linear(1920, num_classes)
    bound = 1.0 / np.sqrt(c)
    wf = rng.uniform(-bound, bound, size=(c, num_classes)).astype(np.float32)
    bf = rng.uniform(-bound, bound, size=(1, num_classes)).astype(np.float32)
    ncp = _round_up(max(num_classes, 128), 128)
    P["fc_w"] = jnp.asarray(_pad_np(wf, (c, ncp)), jnp.bfloat16)
    P["fc_b"] = jnp.asarray(_pad_np(bf, (1, ncp)))
    P["num_classes"] = num_classes
    return P


# ------------------------------ forward pass ------------------------------
def densenet201_forward(params, x_nchw):
    """Matches DenseNet201.forward: features -> AdaptiveAvgPool2d(1,1) -> flatten -> fc."""
    n, _, hin, win = x_nchw.shape

    # features.conv0 / norm0 / relu0 / pool0
    x2d = stem_forward(x_nchw, params["conv0_w"],
                       params["norm0_scale"], params["norm0_shift"])
    h = (hin + 2 * 3 - 7) // 2 + 1
    w = (win + 2 * 3 - 7) // 2 + 1
    h = (h + 2 - 3) // 2 + 1
    w = (w + 2 - 3) // 2 + 1

    # Per-block feature buffer: (M_pad, K_block) bf16, new channels written in place.
    c = NUM_INIT_FEATURES
    mpad = _round_up(n * h * w, 8)
    buf = jnp.pad(x2d, ((0, mpad - x2d.shape[0]), (0, params["blocks"][0]["kpad"] - c)))

    for bi, block in enumerate(params["blocks"]):
        for lyr in block["layers"]:
            y128 = dense_layer_matmul(buf, lyr["scale1"], lyr["shift1"], lyr["w1"],
                                      lyr["scale2"], lyr["shift2"])
            y32 = conv3x3_tail(y128, lyr["w2"], n=n, h=h, w=w)
            buf = jax.lax.dynamic_update_slice(buf, y32, (0, c))      # dense connectivity
            c += GROWTH
        if block["trans"] is not None:
            t = block["trans"]
            kpad_next = params["blocks"][bi + 1]["kpad"]
            buf = transition_forward(buf, t["scale"], t["shift"], t["w"],
                                     n=n, h=h, w=w, c=c, cout=t["cout"],
                                     kpad_next=kpad_next)
            h //= 2
            w //= 2
            c = t["cout"]

    # features.norm5 (no ReLU) + avgpool + view + fc
    return head_forward(buf, params["norm5_scale"], params["norm5_shift"],
                        params["fc_w"], params["fc_b"],
                        n=n, h=h, w=w, num_classes=params["num_classes"])


# ------------------------------ main ------------------------------
if __name__ == "__main__":
    num_classes = 10                      # small synthetic head size
    params = build_params(num_classes, seed=0)

    key = jax.random.PRNGKey(0)
    x = jax.random.normal(key, (2, 3, 32, 32), dtype=jnp.float32)     # NCHW, like PyTorch

    out = densenet201_forward(params, x)
    out = jax.block_until_ready(out)

    assert out.shape == (2, num_classes), out.shape
    assert bool(jnp.all(jnp.isfinite(out))), "non-finite output"
    print("KERNEL_OK")
</pallas_src>

<mosaic_0001>
module attributes {stable_mosaic.version = 11 : i64} {
  func.func @_matmul_affine_relu_kernel(%arg0: i32, %arg1: memref<128x256xbf16, #tpu.memory_space<vmem>>, %arg2: memref<256x128xbf16, #tpu.memory_space<vmem>>, %arg3: memref<1x128xf32, #tpu.memory_space<vmem>>, %arg4: memref<1x128xf32, #tpu.memory_space<vmem>>, %arg5: memref<128x128xbf16, #tpu.memory_space<vmem>>) attributes {dimension_semantics = [#tpu.dimension_semantics<parallel>], iteration_bounds = array<i64: 4>, scalar_prefetch = 0 : i64, scratch_operands = 0 : i64, tpu.core_type = #tpu.core_type<tc>, window_params = [{transform_indices = @transform_0, window_bounds = array<i64: 128, 256>}, {pipeline_mode = #tpu.pipeline_mode<synchronous>, transform_indices = @transform_1, window_bounds = array<i64: 256, 128>}, {pipeline_mode = #tpu.pipeline_mode<synchronous>, transform_indices = @transform_2, window_bounds = array<i64: 1, 128>}, {pipeline_mode = #tpu.pipeline_mode<synchronous>, transform_indices = @transform_3, window_bounds = array<i64: 1, 128>}, {transform_indices = @transform_4, window_bounds = array<i64: 128, 128>}]} {
    %c0 = arith.constant 0 : index
    %c0_0 = arith.constant 0 : index
    %0 = vector.load %arg1[%c0, %c0_0] : memref<128x256xbf16, #tpu.memory_space<vmem>>, vector<128x256xbf16>
    %c0_1 = arith.constant 0 : index
    %c0_2 = arith.constant 0 : index
    %1 = vector.load %arg2[%c0_1, %c0_2] : memref<256x128xbf16, #tpu.memory_space<vmem>>, vector<256x128xbf16>
    %cst = arith.constant dense<0.000000e+00> : vector<128x128xf32>
    %2 = tpu.matmul %0, %1, %cst {dimension_numbers = #tpu.dot_dimension_numbers<[1], [0], [0], [1], [0, 0, 1, 1], [], []>} : vector<128x256xbf16>, vector<256x128xbf16>, vector<128x128xf32> -> vector<128x128xf32>
    %c0_3 = arith.constant 0 : index
    %c0_4 = arith.constant 0 : index
    %3 = vector.load %arg3[%c0_3, %c0_4] : memref<1x128xf32, #tpu.memory_space<vmem>>, vector<1x128xf32>
    %4 = vector.broadcast %3 : vector<1x128xf32> to vector<128x128xf32>
    %5 = arith.mulf %2, %4 : vector<128x128xf32>
    %c0_5 = arith.constant 0 : index
    %c0_6 = arith.constant 0 : index
    %6 = vector.load %arg4[%c0_5, %c0_6] : memref<1x128xf32, #tpu.memory_space<vmem>>, vector<1x128xf32>
    %7 = vector.broadcast %6 : vector<1x128xf32> to vector<128x128xf32>
    %8 = arith.addf %5, %7 : vector<128x128xf32>
    %cst_7 = arith.constant 0.000000e+00 : f32
    %9 = vector.broadcast %cst_7 : f32 to vector<128x128xf32>
    %10 = arith.maximumf %8, %9 : vector<128x128xf32>
    %11 = arith.truncf %10 : vector<128x128xf32> to vector<128x128xbf16>
    %c0_8 = arith.constant 0 : index
    %c0_9 = arith.constant 0 : index
    %12 = vector.load %arg5[%c0_8, %c0_9] : memref<128x128xbf16, #tpu.memory_space<vmem>>, vector<128x128xbf16>
    tpu.vector_store %arg5[%c0_8, %c0_9], %11 {strides = array<i32>} : memref<128x128xbf16, #tpu.memory_space<vmem>>, vector<128x128xbf16>,
    return
  }
  func.func @transform_0(%arg0: i32) -> (i32, i32) {
    %c0_i32 = arith.constant 0 : i32
    %c0_i32_0 = arith.constant 0 : i32
    return %arg0, %c0_i32 : i32, i32
  }
  func.func @transform_1(%arg0: i32) -> (i32, i32) {
    %c0_i32 = arith.constant 0 : i32
    %c0_i32_0 = arith.constant 0 : i32
    %c0_i32_1 = arith.constant 0 : i32
    return %c0_i32, %c0_i32_0 : i32, i32
  }
  func.func @transform_2(%arg0: i32) -> (i32, i32) {
    %c0_i32 = arith.constant 0 : i32
    %c0_i32_0 = arith.constant 0 : i32
    %c0_i32_1 = arith.constant 0 : i32
    return %c0_i32, %c0_i32_0 : i32, i32
  }
  func.func @transform_3(%arg0: i32) -> (i32, i32) {
    %c0_i32 = arith.constant 0 : i32
    %c0_i32_0 = arith.constant 0 : i32
    %c0_i32_1 = arith.constant 0 : i32
    return %c0_i32, %c0_i32_0 : i32, i32
  }
  func.func @transform_4(%arg0: i32) -> (i32, i32) {
    %c0_i32 = arith.constant 0 : i32
    %c0_i32_0 = arith.constant 0 : i32
    return %arg0, %c0_i32 : i32, i32
  }
}

</mosaic_0001>

<bundles_post_ra>
// kernel: matmul_affine_relu.1
= control target key start
LH: loop header
LB: loop body
LE: loop exit
PB: predicated region body
PF: predicated region fallthrough
CT: control target
= control target key end

     0   :  { %9 = vsyncpa [#allocation3], 0  ;;  %s1539_s0 = inlined_call_operand.hbm [shape: bf16[512,256], index: 0, kind: input, shape index: {}]   ;;  %s1540_s1 = inlined_call_operand.hbm [shape: bf16[256,128], index: 1, kind: input, shape index: {}]   ;;  %s1541_s2 = inlined_call_operand.vmem [shape: f32[1,128], index: 2, kind: input, shape index: {}]   ;;  %s1542_s3 = inlined_call_operand.vmem [shape: f32[1,128], index: 3, kind: input, shape index: {}]   ;;  %s1543_s4 = inlined_call_operand.hbm [shape: bf16[512,128], index: 4, kind: output, shape index: {}]  }
   0x1   :  { %11 = vsyncpa [#allocation3 + $0x1], 0 }
   0x2   :  { %12 = vsyncpa [#allocation6], 0 }
   0x3   :  { %13 = vsyncpa [#allocation4], 0 }
   0x4   :  { %15 = vsyncpa [#allocation4 + $0x1], 0  ;;  %s1275_s15 = smov 0   ;;  %s1277_s16 = smov 0  }
   0x5   :  { %s1279_s17 = smov 0   ;;  %s1281_s18 = smov 0  }
   0x6 LB: > { %s1296_s19 = sadd.s32 4294967295, %s1239_s18   ;;  %s795_s20 = sadd.s32 4294967294, %s1239_s18   ;;  %s1239_s18 = sphi %s1281_s18, %s1562_s18   ;;  %s1235_s17 = sphi %s1279_s17, %s1561_s17   ;;  %s1231_s16 = sphi %s1277_s16, %s1560_s16   ;;  %s1227_s15 = sphi %s1275_s15, %s1559_s15  }
   0x7   : > { %p41_p0 = scmp.ne.s32.totalorder %s1231_s16, %s1227_s15  ;;  %p1544_p1 = scmp.eq.s32.totalorder %s1296_s19, 0 }
   0x8   : > { %p134_p3 = scmp.eq.s32.totalorder %s795_s20, 3  ;;  %p796_p5 = scmp.ge.s32.totalorder %s1239_s18, 1 }
   0x9   : > { %p1305_p4 = por %p1544_p1, %p41_p0  ;;  %p141_p7 = scmp.lt.s32.totalorder %s1239_s18, 5 }
   0xa   : > { %p1310_p6 = por %p134_p3, %p41_p0  ;;  %s1241_s24 = smov [#allocation5]  }
   0xb   : > { %s1547_s21 = scalar_select %p1305_p4, 1, 0 }
   0xc   : > { %s1548_s22 = scalar_select %p1310_p6, 1, 0 }
   0xd   : > { %p1315_p8 = pnand %p796_p5, %p141_p7  ;;  %s153_s25 = sshll.u32 %s1241_s24, 4  ;;  %s154_s25 = int_to_ptr.vmem [resolvable:$true] %s153_s25 }
   0xe   : > { %s1328_s27 = sadd.s32 1, %s1239_s18   ;;  %s28_s28 = sadd.s32 1, %s1235_s17 }
   0xf   : > { %s1549_s23 = scalar_select %p1315_p8, 1, 0 }
  0x10   : > { %p1016_p9 = pneg %p1315_p8  ;;  %s25_s29 = ssub.s32 %s1239_s18, %s1328_s27 }
  0x11   : > { %s1111_s6 = scalar_lea.hbm %s1540_s1, 2048 }
  0x12   : > { %p1323_p10 = pnand %p1016_p9, %p1544_p1  ;;  %p1112_p11 = scmp.ne.s32.totalorder %s1540_s1, %s1111_s6 }
  0x13   : > { %p1118_p3 = scmp.lt.u32.totalorder %s1111_s6, %s1540_s1 }
  0x14   : > { %p1113_p12 = pneg %p1323_p10 }
  0x16   : > { %p1114_p13 = pnand %p1113_p12, %p1112_p11 }
  0x18   : > { %p1115_p0 = pneg %p1114_p13 }
  0x1a   : > { %p1120_p5 = pnand %p1118_p3, %p1115_p0 }
  0x1c   : > { %1123 = shalt.err (!%p1120_p5)
}
  0x1d   : > { %s1124_s11 = scalar_lea.vmem %s154_s25, 2048  ;;  %p1132_p2 = scmp.lt.s32.totalorder %s154_s25, %s154_s25 }
  0x1e   : > { %p1125_p7 = scmp.ne.s32.totalorder %s154_s25, %s1124_s11  ;;  %p1133_p6 = scmp.lt.s32.totalorder %s1124_s11, %s1124_s11 }
  0x20   : > { %p1127_p9 = pnand %p1125_p7, %p1113_p12  ;;  %p1134_p4 = por %p1133_p6, %p1132_p2 }
  0x22   : > { %p1128_p1 = pneg %p1127_p9 }
  0x24   : > { %p1135_p8 = pnand %p1134_p4, %p1128_p1 }
  0x26   : > { %1138 = shalt.err (!%p1135_p8)
}
  0x27   : > { %s1242_s12 = smov 64   ;;  %s1243_s13 = smov 4  }
  0x28   : > { %1019 = dma.hbm_to_vmem [thread:$0]  (!%p1323_p10), %s1540_s1, 2048, %s154_s25, [#allocation6], %s1242_s12, %s1242_s12, %s1243_s13  }
  0x29   : > { %p26_p11 = scmp.eq.s32.totalorder %s25_s29, 0  ;;  %p35_p2 = scmp.ne.s32.totalorder %s1235_s17, %s1231_s16 }
  0x2a   : > { %p36_p1 = scmp.eq.s32.totalorder %s1239_s18, 0  ;;  %p1029_p4 = scmp.lt.s32.totalorder %s1239_s18, 4 }
  0x2b   : > { %s1354_s24 = scalar_select %p26_p11, %s1235_s17, %s28_s28  }
  0x2c   : > { %p37_p6 = por %p36_p1, %p35_p2  ;;  %p1551_p8 = scmp.eq.s32.totalorder %s1296_s19, 3 }
  0x2d   : > { %s173_s5 = sand.u32 1, %s1235_s17   ;;  %s863_s6 = sshll.u32 %s1239_s18, 11 }
  0x2e   : > { %p1358_p12 = por %p1551_p8, %p35_p2  ;;  %s799_s7 = sshll.u32 %s173_s5, 7 }
  0x2f   : > { %s1367_s9 = scalar_lea.hbm %s1539_s0, %s863_s6  ;;  %s177_s25 = scalar_lea.vmem [#allocation2], %s799_s7 }
  0x30   : > { %s185_s28 = sshll.u32 %s177_s25, 4  ;;  %p1369_p10 = pnand %p1029_p4, %p37_p6  ;;  %s1373_s28 = int_to_ptr.vmem [resolvable:$true] %s185_s28 }
  0x31   : > { %s1375_s10 = scalar_lea.sflag [#allocation3], %s173_s5  ;;  %s1139_s11 = scalar_lea.hbm %s1367_s9, 2048 }
  0x32   : > { %p1140_p13 = scmp.ne.s32.totalorder %s1367_s9, %s1139_s11  ;;  %p1141_p0 = pneg %p1369_p10 }
  0x33   : > { %s1144_s14 = scalar_lea.hbm %s1539_s0, 8192  ;;  %p1145_p7 = scmp.lt.u32.totalorder %s1367_s9, %s1539_s0 }
  0x34   : > { %p1142_p3 = pnand %p1141_p0, %p1140_p13  ;;  %p1146_p9 = scmp.lt.u32.totalorder %s1144_s14, %s1139_s11 }
  0x35   : > { %p1148_p2 = scmp.lt.u32.totalorder %s1139_s11, %s1367_s9 }
  0x36   : > { %p1143_p5 = pneg %p1142_p3  ;;  %p1147_p11 = por %p1146_p9, %p1145_p7 }
  0x38   : > { %p1149_p1 = por %p1148_p2, %p1147_p11 }
  0x3a   : > { %p1150_p4 = pnand %p1149_p1, %p1143_p5 }
  0x3c   : > { %1153 = shalt.err (!%p1150_p4)
}
  0x3d   : > { %s1154_s5 = scalar_lea.vmem %s1373_s28, 2048  ;;  %s1244_s7 = smov [#allocation2]  }
  0x3e   : > { %p1155_p6 = scmp.ne.s32.totalorder %s1373_s28, %s1154_s5  ;;  %s1159_s26 = sshll.u32 %s1244_s7, 4  ;;  %s1160_s26 = int_to_ptr.vmem [resolvable:$false] %s1159_s26 }
  0x3f   : > { %s1161_s8 = scalar_lea.vmem %s1160_s26, 4096  ;;  %p1162_p3 = scmp.lt.s32.totalorder %s1373_s28, %s1160_s26 }
  0x40   : > { %p1157_p8 = pnand %p1155_p6, %p1141_p0  ;;  %p1163_p7 = scmp.lt.s32.totalorder %s1161_s8, %s1154_s5 }
  0x42   : > { %p1158_p13 = pneg %p1157_p8  ;;  %p1164_p9 = por %p1163_p7, %p1162_p3 }
  0x44   : > { %p1165_p11 = pnand %p1164_p9, %p1158_p13 }
  0x46   : > { %1168 = shalt.err (!%p1165_p11)
}
  0x47   : > { %s1245_s25 = smov 128   ;;  %s1246_s11 = smov 8  }
  0x48   : > { %1023 = dma.hbm_to_vmem [thread:$0]  (!%p1369_p10), %s1367_s9, 2048, %s1373_s28, %s1375_s10, %s1245_s25, %s1245_s25, %s1246_s11  }
  0x49   : > { %p1554_p0 = scmp.ne.s32.totalorder %s1549_s23, 0 }
  0x4a   : > { %s1406_s12 = sand.u32 (!%p1554_p0), 1, %s1231_s16   ;;  %p1555_p5 = scmp.ne.s32.totalorder (!%p1554_p0), %s1547_s21, 0 }
  0x4b   : > { %197 = sbr.rel (%p1554_p0) target bundleno = 384 (0x180), region = 36  ;;  %s804_s13 = sshll.u32 (!%p1554_p0), %s1406_s12, 7 }
  0x4c   : > { %s200_s14 = scalar_lea.sflag (!%p1554_p0), [#allocation3], %s1406_s12  ;;  %s1410_s20 = scalar_lea.vmem (!%p1554_p0), [#allocation2], %s804_s13 }
  0x52   : > { %1214 = dma.done.wait (%p1555_p5), %s200_s14, 2048  }
  0x53   : > { %1216 = vsyncadd (%p1555_p5), %s200_s14, 4294965248  ;;  %p1556_p10 = scmp.eq.s32.totalorder %s1296_s19, 0 }
  0x55   : > { %1218 = dma.done.wait (%p1556_p10), [#allocation6], 2048   ;;  %p1557_p2 = pmov %p1556_p10 }
  0x56   : > { %v1071_v0 = vld [vmem:[#allocation5 + $0x40] sm:$0xff]   ;;  %v1073_v2 = vld [vmem:[#allocation5 + $0x48] sm:$0xff]   ;;  %v1075_v4 = vld [vmem:[#allocation5 + $0x50] sm:$0xff]   ;;  %s806_s29 = sshll.u32 %s1406_s12, 6  ;;  %s880_s6 = sshll.u32 %s1296_s19, 10 }
  0x57   : > { %1220 = vsyncadd (%p1557_p2), [#allocation6], 4294965248  ;;  %v1072_v1 = vld [vmem:[#allocation5] sm:$0xff]   ;;  %928 = vmatprep.subr.bf16.mxu0 %v1071_v0  ;;  %992 = vmatprep.subr.bf16.mxu1 %v1071_v0  ;;  %v1074_v3 = vld [vmem:[#allocation5 + $0x8] sm:$0xff]   ;;  %s1457_s10 = scalar_lea.vmem [#allocation7], %s806_s29  ;;  %s1492_s8 = scalar_lea.hbm %s1543_s4, %s880_s6 }
  0x58   : > { %929 = vmatpush3.bf16.msra.mxu0 %v1072_v1  ;;  %1000 = vmatpush3.bf16.msra.mxu1 %v1072_v1  ;;  %v1076_v5 = vld [vmem:[#allocation5 + $0x10] sm:$0xff]   ;;  %v1077_v6 = vld [vmem:[#allocation5 + $0x58] sm:$0xff]   ;;  %v1079_v8 = vld [vmem:[#allocation5 + $0x60] sm:$0xff]   ;;  %s712_s5 = sshll.u32 %s1457_s10, 4  ;;  %s699_s19 = scalar_lea.sflag [#allocation4], %s1406_s12  ;;  %s1494_s5 = int_to_ptr.vmem [resolvable:$true] %s712_s5 }
  0x59   : > { %930 = vmatprep.subr.bf16.mxu0 %v1073_v2  ;;  %993 = vmatprep.subr.bf16.mxu1 %v1073_v2  ;;  %v1078_v7 = vld [vmem:[#allocation5 + $0x18] sm:$0xff]   ;;  %v1080_v9 = vld [vmem:[#allocation5 + $0x20] sm:$0xff]   ;;  %v1081_v10 = vld [vmem:[#allocation5 + $0x68] sm:$0xff]   ;;  %s1169_s25 = scalar_lea.vmem %s1494_s5, 1024  ;;  %s1247_s11 = smov [#allocation7]  }
  0x5a   : > { %v1089_v11 = vld [vmem:[%s1410_s20 + $0x4] ss:$8 sps:$4 sm:$0xff]   ;;  %v1083_v14 = vld [vmem:[#allocation5 + $0x70] sm:$0xff]   ;;  %v1085_v16 = vld [vmem:[#allocation5 + $0x78] sm:$0xff]   ;;  %p1170_p1 = scmp.ne.s32.totalorder %s1494_s5, %s1169_s25  ;;  %s1173_s13 = sshll.u32 %s1247_s11, 4  ;;  %s1174_s13 = int_to_ptr.vmem [resolvable:$false] %s1173_s13 }
  0x5b   : > { %v1092_v12 = vld [vmem:[%s1410_s20 + $0x44] ss:$8 sps:$4 sm:$0xff]   ;;  %491 = vmatprep.mubr.bf16.mxu0 %v1089_v11  ;;  %v1084_v15 = vld [vmem:[#allocation5 + $0x30] sm:$0xff]   ;;  %v1086_v17 = vld [vmem:[#allocation5 + $0x38] sm:$0xff]   ;;  %s1175_s14 = scalar_lea.vmem %s1174_s13, 2048  ;;  %p1176_p8 = scmp.lt.s32.totalorder %s1494_s5, %s1174_s13 }
  0x5c   : > { %931 = vmatpush3.bf16.msra.mxu0 %v1074_v3  ;;  %1001 = vmatpush3.bf16.msra.mxu1 %v1074_v3  ;;  %v1082_v13 = vld [vmem:[#allocation5 + $0x28] sm:$0xff]   ;;  %v1093_v20 = vld [vmem:[%s1410_s20 + $0x14] ss:$8 sps:$4 sm:$0xff]   ;;  %v1097_v22 = vld [vmem:[%s1410_s20 + $0x10] ss:$8 sps:$4 sm:$0xff]   ;;  %p1171_p4 = pnand %p1170_p1, %p1358_p12  ;;  %p1177_p13 = scmp.lt.s32.totalorder %s1175_s14, %s1169_s25 }
  0x5d   : > { %932 = vmatprep.subr.bf16.mxu0 %v1075_v4  ;;  %994 = vmatprep.subr.bf16.mxu1 %v1075_v4  ;;  %v1087_v18 = vld [vmem:[%s1410_s20] ss:$8 sps:$4 sm:$0xff]   ;;  %v1095_v21 = vld [vmem:[%s1410_s20 + $0x54] ss:$8 sps:$4 sm:$0xff]   ;;  %v1098_v23 = vld [vmem:[%s1410_s20 + $0x50] ss:$8 sps:$4 sm:$0xff]  }
  0x5e   : > { %523 = vmatprep.mubr.bf16.mxu1 %v1092_v12  ;;  %v1090_v19 = vld [vmem:[%s1410_s20 + $0x40] ss:$8 sps:$4 sm:$0xff]   ;;  %v1099_v24 = vld [vmem:[%s1410_s20 + $0x24] ss:$8 sps:$4 sm:$0xff]   ;;  %v1105_v28 = vld [vmem:[%s1410_s20 + $0x34] ss:$8 sps:$4 sm:$0xff]   ;;  %p1172_p6 = pneg %p1171_p4  ;;  %p1178_p3 = por %p1177_p13, %p1176_p8 }
  0x5f   : > { %v1101_v25 = vld [vmem:[%s1410_s20 + $0x64] ss:$8 sps:$4 sm:$0xff]   ;;  %v1103_v26 = vld [vmem:[%s1410_s20 + $0x20] ss:$8 sps:$4 sm:$0xff]   ;;  %v1107_v29 = vld [vmem:[%s1410_s20 + $0x74] ss:$8 sps:$4 sm:$0xff]  }
  0x60   : > { %933 = vmatpush3.bf16.msra.mxu0 %v1076_v5  ;;  %1002 = vmatpush3.bf16.msra.mxu1 %v1076_v5  ;;  %v1104_v27 = vld [vmem:[%s1410_s20 + $0x60] ss:$8 sps:$4 sm:$0xff]   ;;  %v1109_v30 = vld [vmem:[%s1410_s20 + $0x30] ss:$8 sps:$4 sm:$0xff]   ;;  %p1179_p7 = pnand %p1178_p3, %p1172_p6 }
  0x61   : > { %934 = vmatprep.subr.bf16.mxu0 %v1077_v6  ;;  %995 = vmatprep.subr.bf16.mxu1 %v1077_v6  ;;  %v1110_v31 = vld [vmem:[%s1410_s20 + $0x70] ss:$8 sps:$4 sm:$0xff]   ;;  %v1439_v35 = vld [vmem:[%s1541_s2] ss:$0 sm:$0xff] }
  0x62   : > { %v1444_v41 = vld [vmem:[%s1542_s3] ss:$0 sm:$0xff] }
  0x64   : > { %935 = vmatpush3.bf16.msra.mxu0 %v1078_v7  ;;  %1003 = vmatpush3.bf16.msra.mxu1 %v1078_v7 }
  0x65   : > { %936 = vmatprep.subr.bf16.mxu0 %v1079_v8  ;;  %996 = vmatprep.subr.bf16.mxu1 %v1079_v8 }
  0x68   : > { %937 = vmatpush3.bf16.msra.mxu0 %v1080_v9  ;;  %1004 = vmatpush3.bf16.msra.mxu1 %v1080_v9 }
  0x69   : > { %938 = vmatprep.subr.bf16.mxu0 %v1081_v10  ;;  %997 = vmatprep.subr.bf16.mxu1 %v1081_v10 }
  0x6c   : > { %939 = vmatpush3.bf16.msra.mxu0 %v1082_v13  ;;  %1005 = vmatpush3.bf16.msra.mxu1 %v1082_v13 }
  0x6d   : > { %940 = vmatprep.subr.bf16.mxu0 %v1083_v14  ;;  %998 = vmatprep.subr.bf16.mxu1 %v1083_v14 }
  0x70   : > { %941 = vmatpush3.bf16.msra.mxu0 %v1084_v15  ;;  %1006 = vmatpush3.bf16.msra.mxu1 %v1084_v15 }
  0x71   : > { %942 = vmatprep.subr.bf16.mxu0 %v1085_v16  ;;  %999 = vmatprep.subr.bf16.mxu1 %v1085_v16 }
  0x74   : > { %943 = vmatpush3.bf16.msra.mxu0 %v1086_v17  ;;  %1007 = vmatpush3.bf16.msra.mxu1 %v1086_v17 }
  0x77   : > { %492 = vmatmul.mubr.bf16.vlgmr.msra.gmra.mrb[0].mxu0 %v1087_v18  ;;  %524 = vmatmul.mubr.bf16.vlgmr.msra.gmra.mrb[0].mxu1 %v1090_v19 }
  0x78   : > { %499 = vmatprep.mubr.bf16.mxu0 %v1093_v20  ;;  %531 = vmatprep.mubr.bf16.mxu1 %v1095_v21 }
  0x7f   : > { %500 = vmatmul.mubr.bf16.gmra.mrb[4].mxu0 %v1097_v22  ;;  %532 = vmatmul.mubr.bf16.gmra.mrb[4].mxu1 %v1098_v23 }
  0x80   : > { %507 = vmatprep.mubr.bf16.mxu0 %v1099_v24  ;;  %539 = vmatprep.mubr.bf16.mxu1 %v1101_v25 }
  0x87   : > { %508 = vmatmul.mubr.bf16.gmra.mrb[8].mxu0 %v1103_v26  ;;  %540 = vmatmul.mubr.bf16.gmra.mrb[8].mxu1 %v1104_v27 }
  0x88   : > { %515 = vmatprep.mubr.bf16.mxu0 %v1105_v28  ;;  %547 = vmatprep.mubr.bf16.mxu1 %v1107_v29 }
  0x8f   : > { %516 = vmatmul.mubr.bf16.gmra.mrb[12].mxu0 %v1109_v30  ;;  %548 = vmatmul.mubr.bf16.gmra.mrb[12].mxu1 %v1110_v31 }
 0x14a   : > { %v944_v32 = vpop.f32.mrb[0].mxu0  ;;  %v968_v33 = vpop.f32.mrb[0].mxu1 }
 0x14b   : > { %v945_v34 = vpop.f32.mrb[1].mxu0  ;;  %v969_v36 = vpop.f32.mrb[1].mxu1 }
 0x14c   : > { %v946_v37 = vadd.f32 %v945_v34, %v944_v32  ;;  %v970_v38 = vadd.f32 %v969_v36, %v968_v33  ;;  %v947_v39 = vpop.f32.mrb[2].mxu0  ;;  %v971_v40 = vpop.f32.mrb[2].mxu1 }
 0x14d   : > { %v948_v42 = vpop.f32.mrb[3].mxu0  ;;  %v972_v43 = vpop.f32.mrb[3].mxu1 }
 0x14e   : > { %v563_v44 = vmul.f32 %v946_v37, %v1439_v35  ;;  %v571_v45 = vmul.f32 %v970_v38, %v1439_v35  ;;  %v949_v46 = vadd.f32 %v948_v42, %v947_v39  ;;  %v973_v47 = vadd.f32 %v972_v43, %v971_v40 }
 0x150   : > { %v586_v48 = vadd.f32 %v1444_v41, %v563_v44  ;;  %v594_v49 = vadd.f32 %v1444_v41, %v571_v45  ;;  %v564_v50 = vmul.f32 %v949_v46, %v1439_v35  ;;  %v572_v51 = vmul.f32 %v973_v47, %v1439_v35 }
 0x152   : > { %v587_v52 = vadd.f32 %v1444_v41, %v564_v50  ;;  %v595_v53 = vadd.f32 %v1444_v41, %v572_v51  ;;  %v950_v54 = vpop.f32.mrb[4].mxu0  ;;  %v974_v55 = vpop.f32.mrb[4].mxu1  ;;  %v602_v56 = vmax.f32 %v586_v48, 0.0  ;;  %v610_v57 = vmax.f32 %v594_v49, 0.0 }
 0x153   : > { %v951_v58 = vpop.f32.mrb[5].mxu0  ;;  %v975_v59 = vpop.f32.mrb[5].mxu1 }
 0x154   : > { %v603_v60 = vmax.f32 %v587_v52, 0.0  ;;  %v611_v61 = vmax.f32 %v595_v53, 0.0  ;;  %v952_v62 = vadd.f32 %v951_v58, %v950_v54  ;;  %v976_v63 = vadd.f32 %v975_v59, %v974_v55  ;;  %v953_v0 = vpop.f32.mrb[6].mxu0  ;;  %v977_v1 = vpop.f32.mrb[6].mxu1 }
 0x155   : > { %v954_v2 = vpop.f32.mrb[7].mxu0  ;;  %v978_v3 = vpop.f32.mrb[7].mxu1 }
 0x156   : > { %v884_v4 = vpack.c.bf16 %v603_v60, %v602_v56  ;;  %v904_v5 = vpack.c.bf16 %v611_v61, %v610_v57  ;;  %v565_v6 = vmul.f32 %v952_v62, %v1439_v35  ;;  %v573_v7 = vmul.f32 %v976_v63, %v1439_v35 }
 0x157   : > { %v955_v8 = vadd.f32 %v954_v2, %v953_v0  ;;  %v979_v9 = vadd.f32 %v978_v3, %v977_v1 }
 0x158   : > { %885 = vst [vmem:[%s1457_s10] sm:$0xff] %v884_v4   ;;  %924 = vst [vmem:[%s1457_s10 + $0x20] sm:$0xff] %v904_v5   ;;  %v588_v10 = vadd.f32 %v1444_v41, %v565_v6  ;;  %v596_v11 = vadd.f32 %v1444_v41, %v573_v7 }
 0x159   : > { %v566_v12 = vmul.f32 %v955_v8, %v1439_v35  ;;  %v574_v13 = vmul.f32 %v979_v9, %v1439_v35 }
 0x15a   : > { %v956_v14 = vpop.f32.mrb[8].mxu0  ;;  %v980_v15 = vpop.f32.mrb[8].mxu1  ;;  %v604_v24 = vmax.f32 %v588_v10, 0.0  ;;  %v612_v25 = vmax.f32 %v596_v11, 0.0 }
 0x15b   : > { %v589_v16 = vadd.f32 %v1444_v41, %v566_v12  ;;  %v597_v17 = vadd.f32 %v1444_v41, %v574_v13  ;;  %v957_v18 = vpop.f32.mrb[9].mxu0  ;;  %v981_v19 = vpop.f32.mrb[9].mxu1 }
 0x15c   : > { %v958_v20 = vadd.f32 %v957_v18, %v956_v14  ;;  %v982_v21 = vadd.f32 %v981_v19, %v980_v15  ;;  %v959_v22 = vpop.f32.mrb[10].mxu0  ;;  %v983_v23 = vpop.f32.mrb[10].mxu1 }
 0x15d   : > { %v605_v26 = vmax.f32 %v589_v16, 0.0  ;;  %v613_v27 = vmax.f32 %v597_v17, 0.0  ;;  %v960_v28 = vpop.f32.mrb[11].mxu0  ;;  %v984_v29 = vpop.f32.mrb[11].mxu1 }
 0x15e   : > { %v567_v30 = vmul.f32 %v958_v20, %v1439_v35  ;;  %v575_v31 = vmul.f32 %v982_v21, %v1439_v35  ;;  %v961_v32 = vadd.f32 %v960_v28, %v959_v22  ;;  %v985_v33 = vadd.f32 %v984_v29, %v983_v23 }
 0x15f   : > { %v889_v34 = vpack.c.bf16 %v605_v26, %v604_v24  ;;  %v909_v36 = vpack.c.bf16 %v613_v27, %v612_v25 }
 0x160   : > { %v590_v37 = vadd.f32 %v1444_v41, %v567_v30  ;;  %v598_v38 = vadd.f32 %v1444_v41, %v575_v31  ;;  %v568_v39 = vmul.f32 %v961_v32, %v1439_v35  ;;  %v576_v40 = vmul.f32 %v985_v33, %v1439_v35 }
 0x161   : > { %921 = vst [vmem:[%s1457_s10 + $0x8] sm:$0xff] %v889_v34   ;;  %925 = vst [vmem:[%s1457_s10 + $0x28] sm:$0xff] %v909_v36  }
 0x162   : > { %v591_v42 = vadd.f32 %v1444_v41, %v568_v39  ;;  %v599_v43 = vadd.f32 %v1444_v41, %v576_v40  ;;  %v962_v44 = vpop.f32.mrb[12].mxu0  ;;  %v986_v45 = vpop.f32.mrb[12].mxu1  ;;  %v606_v46 = vmax.f32 %v590_v37, 0.0  ;;  %v614_v47 = vmax.f32 %v598_v38, 0.0 }
 0x163   : > { %v963_v48 = vpop.f32.mrb[13].mxu0  ;;  %v987_v49 = vpop.f32.mrb[13].mxu1 }
 0x164   : > { %v607_v50 = vmax.f32 %v591_v42, 0.0  ;;  %v615_v51 = vmax.f32 %v599_v43, 0.0  ;;  %v964_v52 = vadd.f32 %v963_v48, %v962_v44  ;;  %v988_v53 = vadd.f32 %v987_v49, %v986_v45  ;;  %v965_v54 = vpop.f32.mrb[14].mxu0  ;;  %v989_v55 = vpop.f32.mrb[14].mxu1 }
 0x165   : > { %v966_v56 = vpop.f32.mrb[15].mxu0  ;;  %v990_v57 = vpop.f32.mrb[15].mxu1 }
 0x166   : > { %v894_v58 = vpack.c.bf16 %v607_v50, %v606_v46  ;;  %v914_v59 = vpack.c.bf16 %v615_v51, %v614_v47  ;;  %v569_v60 = vmul.f32 %v964_v52, %v1439_v35  ;;  %v577_v61 = vmul.f32 %v988_v53, %v1439_v35 }
 0x167   : > { %v967_v62 = vadd.f32 %v966_v56, %v965_v54  ;;  %v991_v63 = vadd.f32 %v990_v57, %v989_v55 }
 0x168   : > { %922 = vst [vmem:[%s1457_s10 + $0x10] sm:$0xff] %v894_v58   ;;  %926 = vst [vmem:[%s1457_s10 + $0x30] sm:$0xff] %v914_v59   ;;  %v592_v0 = vadd.f32 %v1444_v41, %v569_v60  ;;  %v600_v1 = vadd.f32 %v1444_v41, %v577_v61 }
 0x169   : > { %v570_v2 = vmul.f32 %v967_v62, %v1439_v35  ;;  %v578_v3 = vmul.f32 %v991_v63, %v1439_v35 }
 0x16a   : > { %v608_v6 = vmax.f32 %v592_v0, 0.0  ;;  %v616_v7 = vmax.f32 %v600_v1, 0.0 }
 0x16b   : > { %v593_v4 = vadd.f32 %v1444_v41, %v570_v2  ;;  %v601_v5 = vadd.f32 %v1444_v41, %v578_v3 }
 0x16d   : > { %v609_v8 = vmax.f32 %v593_v4, 0.0  ;;  %v617_v9 = vmax.f32 %v601_v5, 0.0 }
 0x16f   : > { %v899_v35 = vpack.c.bf16 %v609_v8, %v608_v6  ;;  %v919_v10 = vpack.c.bf16 %v617_v9, %v616_v7 }
 0x171   : > { %923 = vst [vmem:[%s1457_s10 + $0x18] sm:$0xff] %v899_v35   ;;  %927 = vst [vmem:[%s1457_s10 + $0x38] sm:$0xff] %v919_v10  }
 0x172   : > { %1182 = shalt.err (!%p1179_p7)
}
 0x173   : > { %s1183_s20 = scalar_lea.hbm %s1492_s8, 1024  ;;  %s1187_s9 = scalar_lea.hbm %s1543_s4, 4096 }
 0x174   : > { %p1184_p9 = scmp.ne.s32.totalorder %s1492_s8, %s1183_s20  ;;  %p1188_p5 = scmp.lt.u32.totalorder %s1492_s8, %s1543_s4 }
 0x175   : > { %p1189_p10 = scmp.lt.u32.totalorder %s1187_s9, %s1183_s20  ;;  %p1191_p1 = scmp.lt.u32.totalorder %s1183_s20, %s1492_s8 }
 0x176   : > { %p1185_p11 = pnand %p1184_p9, %p1358_p12 }
 0x177   : > { %p1190_p2 = por %p1189_p10, %p1188_p5 }
 0x178   : > { %p1186_p0 = pneg %p1185_p11 }
 0x179   : > { %p1192_p4 = por %p1191_p1, %p1190_p2 }
 0x17b   : > { %p1193_p6 = pnand %p1192_p4, %p1186_p0 }
 0x17d   : > { %1196 = shalt.err (!%p1193_p6)
}
 0x17e   : > { %s1248_s10 = smov 64   ;;  %s1249_s6 = smov 4  }
 0x17f   : > { %1014 = dma.vmem_to_hbm [thread:$0]  (%p1358_p12), %s1494_s5, 1024, %s1492_s8, %s699_s19, %s1248_s10, %s1248_s10, %s1249_s6  }
 0x180 PF: > { %p1031_p8 = scmp.ge.s32.totalorder %s1239_s18, 2  ;;  %s727_s7 = sand.u32 1, %s1227_s15  }
 0x181   : > { %p1558_p13 = scmp.ne.s32.totalorder %s1548_s22, 0  ;;  %s728_s26 = scalar_lea.sflag [#allocation4], %s727_s7 }
 0x183   : > { %p1025_p3 = pnand %p1031_p8, %p1558_p13 }
 0x185   : > { %1222 = dma.done.wait (!%p1025_p3), %s728_s26, 1024  }
 0x186   : > { %1224 = vsyncadd (!%p1025_p3), %s728_s26, 4294966272  ;;  %p18_p7 = scmp.ge.s32.totalorder %s1328_s27, 6   ;;  %s1559_s15 = smov %s1231_s16 }
 0x187   : > { %s1560_s16 = smov %s1235_s17  ;;  %s1561_s17 = smov %s1354_s24 }
 0x188   : > { %s1562_s18 = smov %s1328_s27  ;;  %20 = sbr.rel (!%p18_p7) target bundleno = 6 (0x6), region = 85 }
 0x18f   :  { %733 = vsyncpa [#allocation3], 1 }
 0x190   :  { %735 = vsyncpa [#allocation3 + $0x1], 1 }
 0x191   :  { %736 = vsyncpa [#allocation6], 1 }
 0x192   :  { %737 = vsyncpa [#allocation4], 1 }
 0x193   :  { %739 = vsyncpa [#allocation4 + $0x1], 1 }

</bundles_post_ra>
